<compile_context>
chip_gen: v7x
topology: tpu7x:2x2x1
jax: 0.10.0
libtpu: 0.0.40
codegen_flags: <defaults>
</compile_context>

<pallas_src>
import jax
import jax.numpy as jnp
from jax.experimental import pallas as pl
from jax.experimental.pallas import tpu as pltpu


# ---------------------------------------------------------------------------
# helpers: sizes and one-time weight re-layout (outside the kernels)
# ---------------------------------------------------------------------------
def _round_up(a, m):
    return ((a + m - 1) // m) * m


def _row_block(n, target=512, mult=32):
    # row tile for the two parallel matmul kernels, decoupled from Tc*B
    rb = min(_round_up(n, mult), target)
    return rb, _round_up(n, rb)


def _interleave_gate_cols(wf, wb, H):
    # (K,3H),(K,3H) gate order [r,z,n] -> (K,6H) columns [rf rb zf zb nf nb]
    K = wf.shape[0]
    stacked = jnp.stack([wf.reshape(K, 3, H), wb.reshape(K, 3, H)], axis=2)
    return stacked.reshape(K, 6 * H)


def _block_diag_interleaved(whf, whb, H):
    # (H,3H),(H,3H) -> (2H,6H): rows 0:H act on h_f, rows H:2H act on h_b,
    # columns interleaved [rf rb zf zb nf nb] (matches _interleave_gate_cols).
    # NOTE: free only while 2H fits one MXU contraction tile (H<=64 v5e,
    # H<=128 v6e/v7x); beyond that use two per-direction dots instead.
    z = jnp.zeros((H, H), whf.dtype)
    cols = []
    for g in range(3):
        cols.append(jnp.concatenate([whf[:, g * H:(g + 1) * H], z], axis=0))
        cols.append(jnp.concatenate([z, whb[:, g * H:(g + 1) * H]], axis=0))
    return jnp.concatenate(cols, axis=1)


def _pad_cols(w, new_cols):
    pad = new_cols - w.shape[-1]
    return w if pad == 0 else jnp.pad(w, ((0, 0), (0, pad)))


# ---------------------------------------------------------------------------
# Kernel 1: input projection x @ W_ih(+folded bias) for BOTH directions
# ---------------------------------------------------------------------------
def proj_kernel(x_ref, w_ref, b_ref, o_ref):
    o_ref[...] = (jnp.dot(x_ref[...], w_ref[...],
                          preferred_element_type=jnp.float32) + b_ref[...])


def input_proj_pallas(x_flat, w, b, rb):
    N, D = x_flat.shape
    H6 = w.shape[1]
    const = lambda i: (0, 0)
    return pl.pallas_call(
        proj_kernel,
        out_shape=jax.ShapeDtypeStruct((N, H6), jnp.float32),
        grid_spec=pltpu.PrefetchScalarGridSpec(
            num_scalar_prefetch=0,
            grid=(N // rb,),
            in_specs=[pl.BlockSpec((rb, D), lambda i: (i, 0)),
                      pl.BlockSpec((D, H6), const),
                      pl.BlockSpec((1, H6), const)],
            out_specs=pl.BlockSpec((rb, H6), lambda i: (i, 0))),
        compiler_params=pltpu.CompilerParams(
            dimension_semantics=("parallel",)),
    )(x_flat, w, b)


# ---------------------------------------------------------------------------
# Kernel 2: bidirectional GRU recurrence over time chunks (sequential grid)
# ---------------------------------------------------------------------------
def bigru_kernel(gi_ref, len_ref, whh_ref, bhn_ref,
                 hf_out_ref, hb_out_ref, h_sc):
    c = pl.program_id(0)
    NC = pl.num_programs(0)
    Tc = gi_ref.shape[0]
    B = h_sc.shape[0]
    H = hf_out_ref.shape[-1]
    H2, H4 = 2 * H, 4 * H
    T_pad = NC * Tc

    @pl.when(c == 0)
    def _():
        h_sc[...] = jnp.zeros_like(h_sc)

    lens = len_ref[...]                                           # (B,1) int32

    # loop-invariant work hoisted off the serial per-step path
    lane2 = jax.lax.broadcasted_iota(jnp.int32, (1, H2), 1)
    fwd2 = lane2 < H                       # forward half of the (B,2H) state
    bhn = jnp.broadcast_to(bhn_ref[...], (B, H2))   # n-gate hidden bias, once
    t_f0 = c * Tc

    def step(i, hcat):                     # hcat: (B, 2H) = [h_f | h_b]
        t_f = t_f0 + i
        t_b = T_pad - 1 - t_f

        gi = gi_ref[i]                     # (B,6H) pre-merged (fwd t, bwd T-1-t)

        # single fused hidden matmul (block-diagonal weight, both directions)
        gh = jnp.dot(hcat, whh_ref[...], preferred_element_type=jnp.float32)

        r = jax.nn.sigmoid(gi[:, :H2] + gh[:, :H2])               # [r_f|r_b]
        z = jax.nn.sigmoid(gi[:, H2:H4] + gh[:, H2:H4])           # [z_f|z_b]
        n = jnp.tanh(gi[:, H4:] + r * (gh[:, H4:] + bhn))         # [n_f|n_b]
        h_new = (1.0 - z) * n + z * hcat

        # packed-sequence semantics: hold carry, zero emit for t >= length
        tvec = jnp.where(fwd2, t_f, t_b)                          # (1,2H)
        valid = lens > tvec                                       # (B,2H)
        emit = jnp.where(valid, h_new, 0.0)

        hf_out_ref[i] = emit[:, :H]
        hb_out_ref[Tc - 1 - i] = emit[:, H:]
        return jnp.where(valid, h_new, hcat)

    h_sc[...] = jax.lax.fori_loop(0, Tc, step, h_sc[...], unroll=True)


def bigru_pallas(gi_merged, len2d, w_hh_bd, b_hn, H, Tc):
    T_pad, B, H6 = gi_merged.shape
    NC = T_pad // Tc
    H2 = 2 * H
    const = lambda c: (0, 0)
    return pl.pallas_call(
        bigru_kernel,
        out_shape=(jax.ShapeDtypeStruct((T_pad, B, H), jnp.float32),
                   jax.ShapeDtypeStruct((T_pad, B, H), jnp.float32)),
        grid_spec=pltpu.PrefetchScalarGridSpec(
            num_scalar_prefetch=0,
            grid=(NC,),
            in_specs=[pl.BlockSpec((Tc, B, H6), lambda c: (c, 0, 0)),
                      pl.BlockSpec((B, 1), const),
                      pl.BlockSpec((H2, H6), const),
                      pl.BlockSpec((1, H2), const)],
            out_specs=(pl.BlockSpec((Tc, B, H), lambda c: (c, 0, 0)),
                       pl.BlockSpec((Tc, B, H), lambda c: (NC - 1 - c, 0, 0))),
            scratch_shapes=[pltpu.VMEM((B, H2), jnp.float32)]),
        # the carried h_sc requires this grid axis to stay sequential
        compiler_params=pltpu.CompilerParams(
            dimension_semantics=("arbitrary",)),
    )(gi_merged, len2d, w_hh_bd, b_hn)


# ---------------------------------------------------------------------------
# Kernel 3: Tanh + Linear classifier (split weights, no hf/hb concat)
# ---------------------------------------------------------------------------
def classifier_kernel(hf_ref, hb_ref, w1_ref, w2_ref, b_ref, o_ref):
    af = jnp.tanh(hf_ref[...]).astype(w1_ref.dtype)   # tanh in f32, MXU dtype cast
    ab = jnp.tanh(hb_ref[...]).astype(w2_ref.dtype)
    o_ref[...] = (jnp.dot(af, w1_ref[...], preferred_element_type=jnp.float32)
                  + jnp.dot(ab, w2_ref[...], preferred_element_type=jnp.float32)
                  + b_ref[...])


def classifier_pallas(hf_flat, hb_flat, w1, w2, b, rb):
    N, H = hf_flat.shape
    Cpad = w1.shape[1]
    const = lambda i: (0, 0)
    return pl.pallas_call(
        classifier_kernel,
        out_shape=jax.ShapeDtypeStruct((N, Cpad), jnp.float32),
        grid_spec=pltpu.PrefetchScalarGridSpec(
            num_scalar_prefetch=0,
            grid=(N // rb,),
            in_specs=[pl.BlockSpec((rb, H), lambda i: (i, 0)),
                      pl.BlockSpec((rb, H), lambda i: (i, 0)),
                      pl.BlockSpec((H, Cpad), const),
                      pl.BlockSpec((H, Cpad), const),
                      pl.BlockSpec((1, Cpad), const)],
            out_specs=pl.BlockSpec((rb, Cpad), lambda i: (i, 0))),
        compiler_params=pltpu.CompilerParams(
            dimension_semantics=("parallel",)),
    )(hf_flat, hb_flat, w1, w2, b)


# ---------------------------------------------------------------------------
# SeqTagger forward wrapper
# ---------------------------------------------------------------------------
def seq_tagger_forward(x, lengths, params, time_chunk=16,
                       matmul_dtype=jnp.float32):
    # x: (B, T, input_dim) float32 (batch_first=True), lengths: (B,) int32.
    # Assumes max(lengths) == T (what pad_packed_sequence would produce).
    B, T, D = x.shape
    H = params['w_hh_f'].shape[0]
    C = params['w_cls'].shape[1]
    H2, H4, H6 = 2 * H, 4 * H, 6 * H
    Tc = time_chunk
    T_pad = _round_up(T, Tc)

    x_tm = jnp.transpose(x, (1, 0, 2)).astype(jnp.float32)        # (T, B, D)
    if T_pad != T:
        x_tm = jnp.pad(x_tm, ((0, T_pad - T), (0, 0), (0, 0)))
    len2d = lengths.astype(jnp.int32).reshape(B, 1)

    # one-time weight re-layout; fold r/z hidden biases into the K1 bias so the
    # recurrence only keeps the n-gate hidden bias on its serial path
    w_ih_all = _interleave_gate_cols(params['w_ih_f'], params['w_ih_b'], H)
    b_ih_all = _interleave_gate_cols(params['b_ih_f'], params['b_ih_b'], H)
    b_hh_all = _interleave_gate_cols(params['b_hh_f'], params['b_hh_b'], H)
    w_hh_bd = _block_diag_interleaved(params['w_hh_f'], params['w_hh_b'], H)
    b_k1 = jnp.concatenate([b_ih_all[:, :H4] + b_hh_all[:, :H4],
                            b_ih_all[:, H4:]], axis=1)            # (1, 6H)
    b_hn = b_hh_all[:, H4:]                                       # (1, 2H)

    N = T_pad * B
    RB, N_pad = _row_block(N)                                     # 512-row target

    # Kernel 1: hoisted input projection -> (T_pad, B, 6H)
    x_flat = x_tm.reshape(N, D)
    if N_pad != N:
        x_flat = jnp.pad(x_flat, ((0, N_pad - N), (0, 0)))
    gi = input_proj_pallas(x_flat.astype(matmul_dtype),
                           w_ih_all.astype(matmul_dtype), b_k1, RB)[:N]
    gi = gi.reshape(T_pad, B, H6)

    # pre-merge once (off the serial path): forward lanes from time t,
    # backward lanes from time T_pad-1-t
    lane6 = jnp.arange(H6, dtype=jnp.int32).reshape(1, 1, H6)
    fwd6 = (lane6 // H) % 2 == 0
    gi_merged = jnp.where(fwd6, gi, jnp.flip(gi, axis=0))

    # Kernel 2: bidirectional GRU recurrence
    hf, hb = bigru_pallas(gi_merged, len2d, w_hh_bd, b_hn, H, Tc)  # (T_pad,B,H)

    # Kernel 3: tanh + classifier, output lane-padded to 128
    Cpad = _round_up(C, 128)
    w1 = _pad_cols(params['w_cls'][:H], Cpad).astype(matmul_dtype)
    w2 = _pad_cols(params['w_cls'][H:], Cpad).astype(matmul_dtype)
    bc = _pad_cols(params['b_cls'], Cpad)
    hf_flat = hf.reshape(N, H)
    hb_flat = hb.reshape(N, H)
    if N_pad != N:
        hf_flat = jnp.pad(hf_flat, ((0, N_pad - N), (0, 0)))
        hb_flat = jnp.pad(hb_flat, ((0, N_pad - N), (0, 0)))
    logits = classifier_pallas(hf_flat, hb_flat, w1, w2, bc, RB)
    logits = logits[:N, :C].reshape(T_pad, B, C)[:T]              # (T, B, C)
    return jnp.transpose(logits, (1, 2, 0))                       # (B, C, T)


# ---------------------------------------------------------------------------
# Pure-JAX reference (for correctness check)
# ---------------------------------------------------------------------------
def seq_tagger_reference(x, lengths, params):
    B, T, D = x.shape
    H = params['w_hh_f'].shape[0]
    x_tm = jnp.transpose(x, (1, 0, 2)).astype(jnp.float32)
    len2d = lengths.astype(jnp.int32).reshape(B, 1)

    def gru_dir(w_ih, w_hh, b_ih, b_hh, reverse):
        def step(h, xt_t):
            xt, t = xt_t
            gi = xt @ w_ih + b_ih
            gh = h @ w_hh + b_hh
            r = jax.nn.sigmoid(gi[:, :H] + gh[:, :H])
            z = jax.nn.sigmoid(gi[:, H:2 * H] + gh[:, H:2 * H])
            n = jnp.tanh(gi[:, 2 * H:] + r * gh[:, 2 * H:])
            h_new = (1.0 - z) * n + z * h
            valid = len2d > t
            h_new = jnp.where(valid, h_new, h)
            return h_new, jnp.where(valid, h_new, 0.0)
        _, outs = jax.lax.scan(step, jnp.zeros((B, H), jnp.float32),
                               (x_tm, jnp.arange(T)), reverse=reverse)
        return outs                                               # (T, B, H)

    hf = gru_dir(params['w_ih_f'], params['w_hh_f'], params['b_ih_f'],
                 params['b_hh_f'], False)
    hb = gru_dir(params['w_ih_b'], params['w_hh_b'], params['b_ih_b'],
                 params['b_hh_b'], True)
    h = jnp.tanh(jnp.concatenate([hf, hb], axis=-1))
    logits = h @ params['w_cls'] + params['b_cls']                # (T, B, C)
    return jnp.transpose(logits, (1, 2, 0))


# ---------------------------------------------------------------------------
# Deterministic parameter init (shapes follow nn.GRU / nn.Linear)
# ---------------------------------------------------------------------------
def init_params(key, input_dim, hidden_dim, output_dim):
    ks = jax.random.split(key, 10)
    bound_g = 1.0 / jnp.sqrt(hidden_dim)
    bound_c = 1.0 / jnp.sqrt(2 * hidden_dim)
    u = lambda k, shape, b: jax.random.uniform(k, shape, jnp.float32, -b, b)
    return {
        # GRU weights pre-transposed for x @ W: (D,3H)/(H,3H), gate order [r,z,n]
        'w_ih_f': u(ks[0], (input_dim, 3 * hidden_dim), bound_g),
        'w_hh_f': u(ks[1], (hidden_dim, 3 * hidden_dim), bound_g),
        'b_ih_f': u(ks[2], (1, 3 * hidden_dim), bound_g),
        'b_hh_f': u(ks[3], (1, 3 * hidden_dim), bound_g),
        'w_ih_b': u(ks[4], (input_dim, 3 * hidden_dim), bound_g),
        'w_hh_b': u(ks[5], (hidden_dim, 3 * hidden_dim), bound_g),
        'b_ih_b': u(ks[6], (1, 3 * hidden_dim), bound_g),
        'b_hh_b': u(ks[7], (1, 3 * hidden_dim), bound_g),
        # classifier: (2H, C) + (1, C)
        'w_cls': u(ks[8], (2 * hidden_dim, output_dim), bound_c),
        'b_cls': u(ks[9], (1, output_dim), bound_c),
    }


if __name__ == "__main__":
    B, T, INPUT_DIM, HIDDEN_DIM, OUTPUT_DIM = 4, 12, 16, 32, 41

    key = jax.random.PRNGKey(0)
    k_x, k_p = jax.random.split(key)
    x = jax.random.normal(k_x, (B, T, INPUT_DIM), jnp.float32)
    lengths = jnp.array([T, 9, 5, T], dtype=jnp.int32)            # max(lengths)==T
    params = init_params(k_p, INPUT_DIM, HIDDEN_DIM, OUTPUT_DIM)

    ref = jax.block_until_ready(seq_tagger_reference(x, lengths, params))

    # f32 path: tight check against the pure-JAX reference
    out = jax.block_until_ready(seq_tagger_forward(x, lengths, params))
    assert out.shape == (B, OUTPUT_DIM, T), out.shape
    max_err = float(jnp.max(jnp.abs(out - ref)))
    assert jnp.allclose(out, ref, rtol=1e-4, atol=1e-4), max_err

    # bf16 MXU path for K1/K3 (v6e/v7x tuning); recurrence/element-wise stay f32
    out_bf16 = jax.block_until_ready(
        seq_tagger_forward(x, lengths, params, matmul_dtype=jnp.bfloat16))
    max_err_bf16 = float(jnp.max(jnp.abs(out_bf16 - ref)))
    assert max_err_bf16 < 5e-2, max_err_bf16

    print("KERNEL_OK")
</pallas_src>

<mosaic_0001>
module attributes {stable_mosaic.version = 11 : i64} {
  func.func @proj_kernel(%arg0: i32, %arg1: memref<64x16xf32, #tpu.memory_space<vmem>>, %arg2: memref<16x192xf32, #tpu.memory_space<vmem>>, %arg3: memref<1x192xf32, #tpu.memory_space<vmem>>, %arg4: memref<64x192xf32, #tpu.memory_space<vmem>>) attributes {dimension_semantics = [#tpu.dimension_semantics<parallel>], iteration_bounds = array<i64: 1>, scalar_prefetch = 0 : i64, scratch_operands = 0 : i64, tpu.core_type = #tpu.core_type<tc>, window_params = [{transform_indices = @transform_0, window_bounds = array<i64: 64, 16>}, {pipeline_mode = #tpu.pipeline_mode<synchronous>, transform_indices = @transform_1, window_bounds = array<i64: 16, 192>}, {pipeline_mode = #tpu.pipeline_mode<synchronous>, transform_indices = @transform_2, window_bounds = array<i64: 1, 192>}, {transform_indices = @transform_3, window_bounds = array<i64: 64, 192>}]} {
    %c0 = arith.constant 0 : index
    %c0_0 = arith.constant 0 : index
    %0 = vector.load %arg1[%c0, %c0_0] : memref<64x16xf32, #tpu.memory_space<vmem>>, vector<64x16xf32>
    %c0_1 = arith.constant 0 : index
    %c0_2 = arith.constant 0 : index
    %1 = vector.load %arg2[%c0_1, %c0_2] : memref<16x192xf32, #tpu.memory_space<vmem>>, vector<16x192xf32>
    %cst = arith.constant dense<0.000000e+00> : vector<64x192xf32>
    %2 = tpu.matmul %0, %1, %cst {dimension_numbers = #tpu.dot_dimension_numbers<[1], [0], [0], [1], [0, 0, 1, 1], [], []>} : vector<64x16xf32>, vector<16x192xf32>, vector<64x192xf32> -> vector<64x192xf32>
    %c0_3 = arith.constant 0 : index
    %c0_4 = arith.constant 0 : index
    %3 = vector.load %arg3[%c0_3, %c0_4] : memref<1x192xf32, #tpu.memory_space<vmem>>, vector<1x192xf32>
    %4 = vector.broadcast %3 : vector<1x192xf32> to vector<64x192xf32>
    %5 = arith.addf %2, %4 : vector<64x192xf32>
    %c0_5 = arith.constant 0 : index
    %c0_6 = arith.constant 0 : index
    %6 = vector.load %arg4[%c0_5, %c0_6] : memref<64x192xf32, #tpu.memory_space<vmem>>, vector<64x192xf32>
    tpu.vector_store %arg4[%c0_5, %c0_6], %5 {strides = array<i32>} : memref<64x192xf32, #tpu.memory_space<vmem>>, vector<64x192xf32>,
    return
  }
  func.func @transform_0(%arg0: i32) -> (i32, i32) {
    %c0_i32 = arith.constant 0 : i32
    %c0_i32_0 = arith.constant 0 : i32
    return %arg0, %c0_i32 : i32, i32
  }
  func.func @transform_1(%arg0: i32) -> (i32, i32) {
    %c0_i32 = arith.constant 0 : i32
    %c0_i32_0 = arith.constant 0 : i32
    %c0_i32_1 = arith.constant 0 : i32
    return %c0_i32, %c0_i32_0 : i32, i32
  }
  func.func @transform_2(%arg0: i32) -> (i32, i32) {
    %c0_i32 = arith.constant 0 : i32
    %c0_i32_0 = arith.constant 0 : i32
    %c0_i32_1 = arith.constant 0 : i32
    return %c0_i32, %c0_i32_0 : i32, i32
  }
  func.func @transform_3(%arg0: i32) -> (i32, i32) {
    %c0_i32 = arith.constant 0 : i32
    %c0_i32_0 = arith.constant 0 : i32
    return %arg0, %c0_i32 : i32, i32
  }
}

</mosaic_0001>

<bundles_post_ra>
// kernel: tpu_custom_call.1
= control target key start
LH: loop header
LB: loop body
LE: loop exit
PB: predicated region body
PF: predicated region fallthrough
CT: control target
= control target key end

     0   :  { %v252_v5 = vmov 0.0   ;;  %vm39_vm0 = vcmask 130048   ;;  %s343_s0 = inlined_call_operand.vmem [shape: f32[64,16], index: 0, kind: input, shape index: {}]   ;;  %s344_s1 = inlined_call_operand.vmem [shape: f32[16,192], index: 1, kind: input, shape index: {}]   ;;  %s345_s2 = inlined_call_operand.vmem [shape: f32[1,192], index: 2, kind: input, shape index: {}]   ;;  %s346_s3 = inlined_call_operand.hbm [shape: f32[64,192], index: 3, kind: output, shape index: {}]  }
   0x1   :  { %v24_v0 = vld [vmem:[%s344_s1 + $0x8] sm:$0xff]  ;;  %v26_v1 = vld [vmem:[%s344_s1 + $0x18] sm:$0xff]  ;;  %v23_v2 = vld [vmem:[%s344_s1] sm:$0xff]  ;;  %128 = vmatprep.mubr.f32.mxu0 %v252_v5  ;;  %152 = vmatprep.mubr.f32.mxu1 %v252_v5 }
   0x2   :  { %v218_v3 = vpack.c.bf16 %v26_v1, %v24_v0  ;;  %v25_v4 = vld [vmem:[%s344_s1 + $0x10] sm:$0xff]  ;;  %v15_v7 = vld [vmem:[%s343_s0] sm:$0xff] }
   0x3   :  { %v220_v6 = vpack.c.bf16 %v25_v4, %v23_v2  ;;  %v19_v8 = vld [vmem:[%s343_s0 + $0x20] sm:$0xff] }
   0x4   :  { %219 = vmatprep.subr.bf16.mxu0 %v218_v3  ;;  %222 = vmatprep.subr.bf16.mxu1 %v218_v3 }
   0x5   :  { %221 = vmatpush1.bf16.msra.mxu0 %v220_v6  ;;  %223 = vmatpush1.bf16.msra.mxu1 %v220_v6 }
   0x6   :  { %8 = vsyncpa [#allocation3], 0  ;;  %v16_v9 = vld [vmem:[%s343_s0 + $0x8] sm:$0xff]  ;;  %v17_v11 = vld [vmem:[%s343_s0 + $0x10] sm:$0xff]  ;;  %v29_v15 = vlaneseq  ;;  %vm178_vm1 = vcmask 523264  }
   0x7   :  { %v20_v10 = vld [vmem:[%s343_s0 + $0x28] sm:$0xff]  ;;  %v21_v12 = vld [vmem:[%s343_s0 + $0x30] sm:$0xff]  ;;  %v18_v13 = vld [vmem:[%s343_s0 + $0x18] sm:$0xff] }
   0x8   :  { %210 = vmatmul.mubr.msk.f32.vlgmr.msra.gmra.mrb[0].mxu0 %vm39_vm0, %v15_v7  ;;  %214 = vmatmul.mubr.msk.f32.vlgmr.msra.gmra.mrb[0].mxu1 %vm39_vm0, %v19_v8  ;;  %v22_v14 = vld [vmem:[%s343_s0 + $0x38] sm:$0xff]  ;;  %v30_v16 = vshrl.u32 %v29_v15, 7  ;;  %v27_v18 = vld [vmem:[%s345_s2] sm:$0x3]  ;;  %s253_s0 = smov [#allocation2]  }
   0x9   :  { %134 = vmatprep.mubr.f32.mxu0 %v252_v5  ;;  %158 = vmatprep.mubr.f32.mxu1 %v252_v5  ;;  %s199_s2 = sshll.u32 %s253_s0, 4  ;;  %s200_s2 = int_to_ptr.vmem [resolvable:$true] %s199_s2 }
   0xa   :  { %v31_v17 = vsub.s32 0, %v30_v16  ;;  %v35_v19 = vsub.s32 1, %v30_v16  ;;  %s228_s10 = scalar_lea.vmem %s200_s2, 2048  ;;  %p233_p1 = scmp.lt.s32.totalorder %s200_s2, %s200_s2 }
   0xb   :  { %p229_p0 = scmp.ne.s32.totalorder %s200_s2, %s228_s10  ;;  %p234_p2 = scmp.lt.s32.totalorder %s228_s10, %s228_s10 }
   0xc   :  { %211 = vmatmul.mubr.msk.f32.gmra.mrb[2].mxu0 %vm39_vm0, %v16_v9  ;;  %215 = vmatmul.mubr.msk.f32.gmra.mrb[2].mxu1 %vm39_vm0, %v20_v10  ;;  %v32_v20 = vrot.slane %v27_v18, %v31_v17  ;;  %v36_v21 = vrot.slane %v27_v18, %v35_v19 }
   0xd   :  { %140 = vmatprep.mubr.f32.mxu0 %v252_v5  ;;  %164 = vmatprep.mubr.f32.mxu1 %v252_v5  ;;  %p235_p3 = por %p234_p2, %p233_p1 }
   0xf   :  { %p236_p4 = pnand %p235_p3, %p229_p0 }
  0x10   :  { %212 = vmatmul.mubr.msk.f32.gmra.mrb[4].mxu0 %vm39_vm0, %v17_v11  ;;  %216 = vmatmul.mubr.msk.f32.gmra.mrb[4].mxu1 %vm39_vm0, %v21_v12 }
  0x11   :  { %146 = vmatprep.mubr.f32.mxu0 %v252_v5  ;;  %170 = vmatprep.mubr.f32.mxu1 %v252_v5 }
  0x14   :  { %213 = vmatmul.mubr.msk.f32.gmra.mrb[6].mxu0 %vm39_vm0, %v18_v13  ;;  %217 = vmatmul.mubr.msk.f32.gmra.mrb[6].mxu1 %vm39_vm0, %v22_v14 }
  0xdb   :  { %v130_v22 = vpop.f32.mrb[0].mxu0  ;;  %v154_v23 = vpop.f32.mrb[0].mxu1 }
  0xdc   :  { %v131_v24 = vadd.f32 %v130_v22, %v32_v20  ;;  %v155_v25 = vadd.f32 %v154_v23, %v32_v20  ;;  %v132_v26 = vpop.f32.mrb[1].mxu0  ;;  %v156_v27 = vpop.f32.mrb[1].mxu1 }
  0xdd   :  { %v133_v28 = vadd.f32 %v132_v26, %v36_v21  ;;  %v157_v29 = vadd.f32 %v156_v27, %v36_v21 }
  0xde   :  { %177 = vst [vmem:[#allocation2] sm:$0xff] %v131_v24  ;;  %186 = vst [vmem:[#allocation2 + $0x40] sm:$0xff] %v155_v25 }
  0xdf   :  { %179 = vst.msk [vmem:[#allocation2 + $0x8] sm:$0xff] %vm178_vm1, %v133_v28  ;;  %187 = vst.msk [vmem:[#allocation2 + $0x48] sm:$0xff] %vm178_vm1, %v157_v29  ;;  %v136_v30 = vpop.f32.mrb[2].mxu0  ;;  %v160_v31 = vpop.f32.mrb[2].mxu1 }
  0xe0   :  { %v137_v32 = vadd.f32 %v136_v30, %v32_v20  ;;  %v161_v33 = vadd.f32 %v160_v31, %v32_v20  ;;  %v138_v34 = vpop.f32.mrb[3].mxu0  ;;  %v162_v35 = vpop.f32.mrb[3].mxu1 }
  0xe1   :  { %v139_v36 = vadd.f32 %v138_v34, %v36_v21  ;;  %v163_v37 = vadd.f32 %v162_v35, %v36_v21 }
  0xe2   :  { %180 = vst [vmem:[#allocation2 + $0x10] sm:$0xff] %v137_v32  ;;  %188 = vst [vmem:[#allocation2 + $0x50] sm:$0xff] %v161_v33 }
  0xe3   :  { %181 = vst.msk [vmem:[#allocation2 + $0x18] sm:$0xff] %vm178_vm1, %v139_v36  ;;  %189 = vst.msk [vmem:[#allocation2 + $0x58] sm:$0xff] %vm178_vm1, %v163_v37  ;;  %v142_v38 = vpop.f32.mrb[4].mxu0  ;;  %v166_v39 = vpop.f32.mrb[4].mxu1 }
  0xe4   :  { %v143_v40 = vadd.f32 %v142_v38, %v32_v20  ;;  %v167_v41 = vadd.f32 %v166_v39, %v32_v20  ;;  %v144_v42 = vpop.f32.mrb[5].mxu0  ;;  %v168_v43 = vpop.f32.mrb[5].mxu1 }
  0xe5   :  { %v145_v44 = vadd.f32 %v144_v42, %v36_v21  ;;  %v169_v45 = vadd.f32 %v168_v43, %v36_v21 }
  0xe6   :  { %182 = vst [vmem:[#allocation2 + $0x20] sm:$0xff] %v143_v40  ;;  %190 = vst [vmem:[#allocation2 + $0x60] sm:$0xff] %v167_v41 }
  0xe7   :  { %183 = vst.msk [vmem:[#allocation2 + $0x28] sm:$0xff] %vm178_vm1, %v145_v44  ;;  %191 = vst.msk [vmem:[#allocation2 + $0x68] sm:$0xff] %vm178_vm1, %v169_v45  ;;  %v148_v46 = vpop.f32.mrb[6].mxu0  ;;  %v172_v47 = vpop.f32.mrb[6].mxu1 }
  0xe8   :  { %v149_v48 = vadd.f32 %v148_v46, %v32_v20  ;;  %v173_v49 = vadd.f32 %v172_v47, %v32_v20  ;;  %v150_v50 = vpop.f32.mrb[7].mxu0  ;;  %v174_v51 = vpop.f32.mrb[7].mxu1 }
  0xe9   :  { %v151_v52 = vadd.f32 %v150_v50, %v36_v21  ;;  %v175_v53 = vadd.f32 %v174_v51, %v36_v21 }
  0xea   :  { %184 = vst [vmem:[#allocation2 + $0x30] sm:$0xff] %v149_v48  ;;  %192 = vst [vmem:[#allocation2 + $0x70] sm:$0xff] %v173_v49 }
  0xeb   :  { %185 = vst.msk [vmem:[#allocation2 + $0x38] sm:$0xff] %vm178_vm1, %v151_v52  ;;  %193 = vst.msk [vmem:[#allocation2 + $0x78] sm:$0xff] %vm178_vm1, %v175_v53 }
  0xec   :  { %239 = shalt.err (!%p236_p4)
}
  0xed   :  { %s240_s13 = scalar_lea.hbm %s346_s3, 2048 }
  0xee   :  { %p241_p5 = scmp.ne.s32.totalorder %s346_s3, %s240_s13  ;;  %p244_p6 = scmp.lt.u32.totalorder %s240_s13, %s346_s3 }
  0xf0   :  { %p246_p7 = pnand %p244_p6, %p241_p5 }
  0xf2   :  { %249 = shalt.err (!%p246_p7)
}
  0xf3   :  { %s254_s18 = smov 256   ;;  %s255_s19 = smov 16  }
  0xf4   :  { %205 = dma.vmem_to_hbm [thread:$0]  %s200_s2, 2048, %s346_s3, [#allocation3], %s254_s18, %s254_s18, %s255_s19  }
  0xf5   :  { %250 = dma.done.wait [#allocation3], 2048  }
  0xf6   :  { %251 = vsyncadd [#allocation3], 4294965248 }
  0xf7   :  { %209 = vsyncpa [#allocation3], 1 }

</bundles_post_ra>
